<compile_context>
chip_gen: v7x
topology: tpu7x:2x2x1
jax: 0.10.0
libtpu: 0.0.40
codegen_flags: <defaults>
</compile_context>

<pallas_src>
import functools
import math
import numpy as np
import jax
import jax.numpy as jnp
from jax.experimental import pallas as pl
from jax.experimental.pallas import tpu as pltpu


# ----------------------------- constants (deterministic, __init__-equivalent) ----

def _round_up(x, m):
    return ((x + m - 1) // m) * m


def mel_filter_bank_np(n_mels=80, n_fft=512, sample_rate=16000, f_min=20.0, f_max=7600.0):
    """Exact replica of the PyTorch mel_filter_bank() in numpy. Also returns bin edges."""
    mel_scale = np.linspace(1125 * math.log(1 + f_min / 700.0),
                            1125 * math.log(1 + f_max / 700.0),
                            n_mels + 2)
    hz_scale = 700.0 * (np.exp(mel_scale / 1125.0) - 1.0)
    bin_edges = np.floor((n_fft + 1) * hz_scale / sample_rate).astype(np.int64)
    fb = np.zeros((n_mels, n_fft // 2 + 1), dtype=np.float32)
    for i in range(1, n_mels + 1):
        left, center, right = int(bin_edges[i - 1]), int(bin_edges[i]), int(bin_edges[i + 1])
        for j in range(left, center):
            fb[i - 1, j] = (j - left) / (center - left)
        for j in range(center, right):
            fb[i - 1, j] = (right - j) / (right - center)
    return fb, bin_edges


def hamming_window_np(win_length):
    # torch.hamming_window default: periodic=True, alpha=0.54, beta=0.46
    n = np.arange(win_length, dtype=np.float64)
    return 0.54 - 0.46 * np.cos(2.0 * np.pi * n / win_length)


def dft_basis_np(n_fft, n_freq):
    # One-sided real DFT basis, bins 0..n_freq-1:
    #   X[k] = sum_n x[n] * exp(-2*pi*i*k*n/n_fft)
    n = np.arange(n_fft, dtype=np.float64)[:, None]
    k = np.arange(n_freq, dtype=np.float64)[None, :]
    ang = 2.0 * np.pi * n * k / n_fft
    return np.cos(ang), -np.sin(ang)          # each (n_fft, n_freq)


# ----------------------------------- kernel --------------------------------------

def mel_spec_kernel(main_ref, tail_ref, basis_ref, melT_ref, out_ref, *,
                    n_freq, nb, tT):
    # main_ref : (1, tT, hop)        bf16  hop-blocks t*tT .. t*tT+tT-1
    # tail_ref : (1, tail_rows, hop) bf16  hop-blocks t*tT+tT .. (overlap for last frames)
    # basis_ref: (nb*hop, 2*n_freq)  bf16  windowed [cos | sin], zero rows past n_fft
    # melT_ref : (n_freq, n_mels_pad) f32
    # out_ref  : (1, tT, n_mels_pad)  f32
    #
    # Frame r of this tile = hop-blocks r, r+1, ..., r+nb-1 concatenated along lanes.
    main = main_ref[0].astype(jnp.float32)                      # (tT, hop)
    tail = tail_ref[0].astype(jnp.float32)                      # (tail_rows, hop)
    full = jnp.concatenate([main, tail], axis=0)                # (tT+tail_rows, hop)
    x = jnp.concatenate([full[j:j + tT] for j in range(nb)], axis=1)   # (tT, nb*hop)
    x = x.astype(jnp.bfloat16)

    ri = jnp.dot(x, basis_ref[...], preferred_element_type=jnp.float32)  # (tT, 2*n_freq)
    re = ri[:, :n_freq]
    im = ri[:, n_freq:]
    power = re * re + im * im                                   # |STFT|^2, f32 (VPU)
    out_ref[0] = jnp.dot(power, melT_ref[...], preferred_element_type=jnp.float32)


# ----------------------------------- wrapper --------------------------------------

def custom_mel_spectrogram(waveform,
                           sample_rate=16000, n_fft=512, win_length=400,
                           hop_length=160, n_mels=80, frame_tile=1024):
    """Equivalent of CustomMelSpectrogram.forward: (B, time) -> (B, n_mels, frames)."""
    waveform = jnp.asarray(waveform, jnp.float32)
    B, _ = waveform.shape
    hop = hop_length
    n_freq_full = n_fft // 2 + 1

    # --- constants (built once, deterministic) ---
    mel_fb, bin_edges = mel_filter_bank_np(n_mels, n_fft, sample_rate)  # (n_mels, n_freq_full)
    # Drop the Nyquist bin (lane-align the frequency axis to 256) only when the
    # mel filterbank provably has no support there.
    if int(bin_edges[-1]) <= n_fft // 2:
        n_freq = n_fft // 2
    else:
        n_freq = n_freq_full
    mel_fb = mel_fb[:, :n_freq]

    win = hamming_window_np(win_length)                                  # float64
    # torch.stft centers a short window inside n_fft by zero padding both sides.
    pad_l = (n_fft - win_length) // 2
    pad_r = n_fft - win_length - pad_l
    window_full = np.pad(win, (pad_l, pad_r))                            # (n_fft,) float64

    nb = -(-n_fft // hop)              # hop-blocks per frame (ceil)
    K = nb * hop                       # frame length seen by the DFT matmul (640)

    cos_mat, sin_mat = dft_basis_np(n_fft, n_freq)                       # (n_fft, n_freq)
    # Fold the window into the DFT basis and zero-extend to K rows:
    #   (x * w) @ C == x @ (diag(w) @ C), rows n_fft..K-1 contribute nothing.
    basis = np.zeros((K, 2 * n_freq), dtype=np.float32)
    basis[:n_fft, :n_freq] = window_full[:, None] * cos_mat
    basis[:n_fft, n_freq:] = window_full[:, None] * sin_mat
    basis_bf16 = jnp.asarray(basis, dtype=jnp.bfloat16)

    n_mels_pad = _round_up(n_mels, 128)                                  # 80 -> 128 lanes
    melT_np = np.zeros((n_freq, n_mels_pad), dtype=np.float32)
    melT_np[:, :n_mels] = mel_fb.T
    melT = jnp.asarray(melT_np)

    # --- glue: center (reflect) pad + hop-block reshape (no overlapping gather) ---
    padded = jnp.pad(waveform, ((0, 0), (n_fft // 2, n_fft // 2)), mode="reflect")
    n_frames = 1 + (padded.shape[1] - n_fft) // hop

    # Balanced frame tiling: split T into ceil(T/frame_tile) near-equal tiles.
    tail_rows = max(8, _round_up(nb - 1, 8))      # overlap rows needed by a tile's last frame
    num_tiles = max(1, -(-n_frames // frame_tile))
    tT = _round_up(-(-n_frames // num_tiles), tail_rows)
    T_pad = num_tiles * tT
    M_pad = T_pad + tail_rows                     # hop-blocks, incl. tail headroom

    total = M_pad * hop
    if total >= padded.shape[1]:
        sig = jnp.pad(padded, ((0, 0), (0, total - padded.shape[1])))
    else:
        sig = padded[:, :total]                   # never drops samples used by real frames
    blocks = sig.astype(jnp.bfloat16).reshape(B, M_pad, hop)             # (B, M_pad, hop)

    grid = (B, num_tiles)
    flops = 2.0 * B * T_pad * K * (2 * n_freq) + 2.0 * B * T_pad * n_freq * n_mels_pad
    bytes_accessed = (blocks.size * 2 + basis.size * 2 + melT.size * 4
                      + B * T_pad * n_mels_pad * 4)

    out = pl.pallas_call(
        functools.partial(mel_spec_kernel, n_freq=n_freq, nb=nb, tT=tT),
        out_shape=jax.ShapeDtypeStruct((B, T_pad, n_mels_pad), jnp.float32),
        grid=grid,
        in_specs=[
            # main hop-blocks of this frame tile
            pl.BlockSpec((1, tT, hop), lambda b, t: (b, t, 0)),
            # overlapping tail blocks right after the tile (element offset (t+1)*tT)
            pl.BlockSpec((1, tail_rows, hop),
                         lambda b, t: (b, (t + 1) * (tT // tail_rows), 0)),
            pl.BlockSpec((K, 2 * n_freq), lambda b, t: (0, 0)),
            pl.BlockSpec((n_freq, n_mels_pad), lambda b, t: (0, 0)),
        ],
        out_specs=pl.BlockSpec((1, tT, n_mels_pad), lambda b, t: (b, t, 0)),
        compiler_params=pltpu.CompilerParams(
            dimension_semantics=("parallel", "parallel")),
        cost_estimate=pl.CostEstimate(flops=int(flops), transcendentals=0,
                                      bytes_accessed=int(bytes_accessed)),
    )(blocks, blocks, basis_bf16, melT)

    # Strip frame/mel padding, then (B, T, n_mels) -> (B, n_mels, T).
    out = out[:, :n_frames, :n_mels]
    return jnp.transpose(out, (0, 2, 1))


# -------------------------------- reference (plain JAX, f32) ----------------------

def _reference(waveform, sample_rate=16000, n_fft=512, win_length=400,
               hop_length=160, n_mels=80):
    waveform = jnp.asarray(waveform, jnp.float32)
    n_freq = n_fft // 2 + 1
    win = hamming_window_np(win_length)
    pad_l = (n_fft - win_length) // 2
    window_full = jnp.asarray(
        np.pad(win, (pad_l, n_fft - win_length - pad_l)).astype(np.float32))
    cos_mat, sin_mat = dft_basis_np(n_fft, n_freq)
    mel_fb = jnp.asarray(mel_filter_bank_np(n_mels, n_fft, sample_rate)[0])
    padded = jnp.pad(waveform, ((0, 0), (n_fft // 2, n_fft // 2)), mode="reflect")
    n_frames = 1 + (padded.shape[1] - n_fft) // hop_length
    idx = jnp.arange(n_frames)[:, None] * hop_length + jnp.arange(n_fft)[None, :]
    frames = padded[:, idx] * window_full[None, None, :]
    re = jnp.einsum("btn,nf->btf", frames, jnp.asarray(cos_mat.astype(np.float32)))
    im = jnp.einsum("btn,nf->btf", frames, jnp.asarray(sin_mat.astype(np.float32)))
    power = re * re + im * im
    mel = jnp.einsum("mf,btf->bmt", mel_fb, power)
    return mel


# ------------------------------------- main ---------------------------------------

if __name__ == "__main__":
    key = jax.random.PRNGKey(0)
    B, L = 2, 1600                       # waveform (batch, time); 1600 samples -> 11 frames
    waveform = jax.random.normal(key, (B, L), dtype=jnp.float32)

    mel = custom_mel_spectrogram(waveform)
    mel = jax.block_until_ready(mel)

    n_frames = 1 + L // 160
    assert mel.shape == (B, 80, n_frames), mel.shape
    assert bool(jnp.all(jnp.isfinite(mel)))

    ref = jax.block_until_ready(_reference(waveform))
    rel_err = float(jnp.max(jnp.abs(mel - ref)) / (jnp.max(jnp.abs(ref)) + 1e-6))
    assert rel_err < 1e-2, f"relative error too large: {rel_err}"

    print("KERNEL_OK")
</pallas_src>

<mosaic_0001>
module attributes {stable_mosaic.version = 11 : i64} {
  func.func @mel_spec_kernel(%arg0: i32, %arg1: i32, %arg2: memref<1x16x160xbf16, #tpu.memory_space<vmem>>, %arg3: memref<1x8x160xbf16, #tpu.memory_space<vmem>>, %arg4: memref<640x512xbf16, #tpu.memory_space<vmem>>, %arg5: memref<256x128xf32, #tpu.memory_space<vmem>>, %arg6: memref<1x16x128xf32, #tpu.memory_space<vmem>>) attributes {dimension_semantics = [#tpu.dimension_semantics<parallel>, #tpu.dimension_semantics<parallel>], iteration_bounds = array<i64: 2, 1>, scalar_prefetch = 0 : i64, scratch_operands = 0 : i64, tpu.core_type = #tpu.core_type<tc>, window_params = [{transform_indices = @transform_0, window_bounds = array<i64: 1, 16, 160>}, {transform_indices = @transform_1, window_bounds = array<i64: 1, 8, 160>}, {pipeline_mode = #tpu.pipeline_mode<synchronous>, transform_indices = @transform_2, window_bounds = array<i64: 640, 512>}, {pipeline_mode = #tpu.pipeline_mode<synchronous>, transform_indices = @transform_3, window_bounds = array<i64: 256, 128>}, {transform_indices = @transform_4, window_bounds = array<i64: 1, 16, 128>}]} {
    %c0 = arith.constant 0 : index
    %c0_0 = arith.constant 0 : index
    %c0_1 = arith.constant 0 : index
    %0 = vector.load %arg2[%c0, %c0_0, %c0_1] : memref<1x16x160xbf16, #tpu.memory_space<vmem>>, vector<1x16x160xbf16>
    %1 = vector.shape_cast %0 : vector<1x16x160xbf16> to vector<16x160xbf16>
    %2 = arith.extf %1 : vector<16x160xbf16> to vector<16x160xf32>
    %c0_2 = arith.constant 0 : index
    %c0_3 = arith.constant 0 : index
    %c0_4 = arith.constant 0 : index
    %3 = vector.load %arg3[%c0_2, %c0_3, %c0_4] : memref<1x8x160xbf16, #tpu.memory_space<vmem>>, vector<1x8x160xbf16>
    %4 = vector.shape_cast %3 : vector<1x8x160xbf16> to vector<8x160xbf16>
    %5 = arith.extf %4 : vector<8x160xbf16> to vector<8x160xf32>
    %6 = tpu.concatenate %2, %5 in 0 : vector<16x160xf32>, vector<8x160xf32> -> vector<24x160xf32>
    %7 = vector.extract_strided_slice %6 {offsets = [0, 0], sizes = [16, 160], strides = [1, 1]} : vector<24x160xf32> to vector<16x160xf32>
    %8 = vector.extract_strided_slice %6 {offsets = [1, 0], sizes = [16, 160], strides = [1, 1]} : vector<24x160xf32> to vector<16x160xf32>
    %9 = vector.extract_strided_slice %6 {offsets = [2, 0], sizes = [16, 160], strides = [1, 1]} : vector<24x160xf32> to vector<16x160xf32>
    %10 = vector.extract_strided_slice %6 {offsets = [3, 0], sizes = [16, 160], strides = [1, 1]} : vector<24x160xf32> to vector<16x160xf32>
    %11 = tpu.concatenate %7, %8, %9, %10 in 1 : vector<16x160xf32>, vector<16x160xf32>, vector<16x160xf32>, vector<16x160xf32> -> vector<16x640xf32>
    %12 = arith.truncf %11 : vector<16x640xf32> to vector<16x640xbf16>
    %c0_5 = arith.constant 0 : index
    %c0_6 = arith.constant 0 : index
    %13 = vector.load %arg4[%c0_5, %c0_6] : memref<640x512xbf16, #tpu.memory_space<vmem>>, vector<640x512xbf16>
    %cst = arith.constant dense<0.000000e+00> : vector<16x512xf32>
    %14 = tpu.matmul %12, %13, %cst {dimension_numbers = #tpu.dot_dimension_numbers<[1], [0], [0], [1], [0, 0, 1, 1], [], []>} : vector<16x640xbf16>, vector<640x512xbf16>, vector<16x512xf32> -> vector<16x512xf32>
    %15 = vector.extract_strided_slice %14 {offsets = [0, 0], sizes = [16, 256], strides = [1, 1]} : vector<16x512xf32> to vector<16x256xf32>
    %16 = vector.extract_strided_slice %14 {offsets = [0, 256], sizes = [16, 256], strides = [1, 1]} : vector<16x512xf32> to vector<16x256xf32>
    %17 = arith.mulf %15, %15 : vector<16x256xf32>
    %18 = arith.mulf %16, %16 : vector<16x256xf32>
    %19 = arith.addf %17, %18 : vector<16x256xf32>
    %c0_7 = arith.constant 0 : index
    %c0_8 = arith.constant 0 : index
    %20 = vector.load %arg5[%c0_7, %c0_8] : memref<256x128xf32, #tpu.memory_space<vmem>>, vector<256x128xf32>
    %cst_9 = arith.constant dense<0.000000e+00> : vector<16x128xf32>
    %21 = tpu.matmul %19, %20, %cst_9 {dimension_numbers = #tpu.dot_dimension_numbers<[1], [0], [0], [1], [0, 0, 1, 1], [], []>} : vector<16x256xf32>, vector<256x128xf32>, vector<16x128xf32> -> vector<16x128xf32>
    %c0_10 = arith.constant 0 : index
    %c0_11 = arith.constant 0 : index
    %c0_12 = arith.constant 0 : index
    %22 = vector.load %arg6[%c0_10, %c0_11, %c0_12] : memref<1x16x128xf32, #tpu.memory_space<vmem>>, vector<1x16x128xf32>
    %23 = vector.shape_cast %22 : vector<1x16x128xf32> to vector<16x128xf32>
    %24 = vector.shape_cast %21 : vector<16x128xf32> to vector<1x16x128xf32>
    tpu.vector_store %arg6[%c0_10, %c0_11, %c0_12], %24 {strides = array<i32>} : memref<1x16x128xf32, #tpu.memory_space<vmem>>, vector<1x16x128xf32>,
    return
  }
  func.func @transform_0(%arg0: i32, %arg1: i32) -> (i32, i32, i32) {
    %c0_i32 = arith.constant 0 : i32
    %c0_i32_0 = arith.constant 0 : i32
    return %arg0, %arg1, %c0_i32 : i32, i32, i32
  }
  func.func @transform_1(%arg0: i32, %arg1: i32) -> (i32, i32, i32) {
    %c1_i32 = arith.constant 1 : i32
    %0 = arith.addi %arg1, %c1_i32 : i32
    %c2_i32 = arith.constant 2 : i32
    %1 = arith.muli %0, %c2_i32 : i32
    %c0_i32 = arith.constant 0 : i32
    %c0_i32_0 = arith.constant 0 : i32
    return %arg0, %1, %c0_i32 : i32, i32, i32
  }
  func.func @transform_2(%arg0: i32, %arg1: i32) -> (i32, i32) {
    %c0_i32 = arith.constant 0 : i32
    %c0_i32_0 = arith.constant 0 : i32
    %c0_i32_1 = arith.constant 0 : i32
    return %c0_i32, %c0_i32_0 : i32, i32
  }
  func.func @transform_3(%arg0: i32, %arg1: i32) -> (i32, i32) {
    %c0_i32 = arith.constant 0 : i32
    %c0_i32_0 = arith.constant 0 : i32
    %c0_i32_1 = arith.constant 0 : i32
    return %c0_i32, %c0_i32_0 : i32, i32
  }
  func.func @transform_4(%arg0: i32, %arg1: i32) -> (i32, i32, i32) {
    %c0_i32 = arith.constant 0 : i32
    %c0_i32_0 = arith.constant 0 : i32
    return %arg0, %arg1, %c0_i32 : i32, i32, i32
  }
}

</mosaic_0001>

<bundles_post_ra>
// kernel: tpu_custom_call.1
= control target key start
LH: loop header
LB: loop body
LE: loop exit
PB: predicated region body
PF: predicated region fallthrough
CT: control target
= control target key end

     0   :  { %s3199_s0 = inlined_call_operand.hbm [shape: bf16[2,24,160], index: 0, kind: input, shape index: {}]   ;;  %s3200_s1 = inlined_call_operand.hbm [shape: bf16[2,24,160], index: 1, kind: input, shape index: {}]   ;;  %s3201_s2 = inlined_call_operand.hbm [shape: bf16[640,512], index: 2, kind: input, shape index: {}]   ;;  %s3202_s3 = inlined_call_operand.hbm [shape: f32[256,128], index: 3, kind: input, shape index: {}]   ;;  %s3203_s4 = inlined_call_operand.hbm [shape: f32[2,16,128], index: 4, kind: output, shape index: {}]  }
   0x1   :  { %3211 = sst [smem:[#allocation18_spill]] %s3199_s0 }
   0x2   :  { %3212 = sst [smem:[#allocation19_spill]] %s3201_s2 }
   0x3   :  { %3213 = sst [smem:[#allocation20_spill]] %s3202_s3 }
   0x4   :  { %9 = vsyncpa [#allocation3], 0 }
   0x5   :  { %11 = vsyncpa [#allocation3 + $0x1], 0 }
   0x6   :  { %12 = vsyncpa [#allocation6], 0 }
   0x7   :  { %14 = vsyncpa [#allocation6 + $0x1], 0 }
   0x8   :  { %15 = vsyncpa [#allocation9], 0 }
   0x9   :  { %16 = vsyncpa [#allocation4], 0 }
   0xa   :  { %18 = vsyncpa [#allocation4 + $0x1], 0  ;;  %s2829_s15 = smov 0   ;;  %s2831_s16 = smov 0  }
   0xb   :  { %s2833_s17 = smov 0   ;;  %s2835_s18 = smov 0  }
   0xc   :  { %s2837_s19 = smov 0   ;;  %s2839_s20 = smov 0  }
   0xd LB: > { %s2860_s21 = sadd.s32 4294967295, %s2787_s20   ;;  %s1922_s22 = sadd.s32 4294967294, %s2787_s20   ;;  %s2787_s20 = sphi %s2839_s20, %s24_s20   ;;  %s2783_s19 = sphi %s2837_s19, %s3244_s19   ;;  %s2779_s18 = sphi %s2835_s18, %s3243_s18   ;;  %s2775_s17 = sphi %s2833_s17, %s3242_s17   ;;  %s2771_s16 = sphi %s2831_s16, %s3241_s16   ;;  %s2767_s15 = sphi %s2829_s15, %s3240_s15  }
   0xe   : > { %p58_p0 = scmp.ne.s32.totalorder %s2771_s16, %s2767_s15  ;;  %p3204_p1 = scmp.eq.s32.totalorder %s2860_s21, 0 }
   0xf   : > { %p164_p3 = scmp.eq.s32.totalorder %s1922_s22, 1  ;;  %p1923_p5 = scmp.ge.s32.totalorder %s2787_s20, 1 }
  0x10   : > { %p2869_p4 = por %p3204_p1, %p58_p0  ;;  %p171_p7 = scmp.lt.s32.totalorder %s2787_s20, 3 }
  0x11   : > { %p2874_p6 = por %p164_p3, %p58_p0  ;;  %s2789_s26 = smov [#allocation7]  }
  0x12   : > { %s3214_s23 = scalar_select %p2869_p4, 1, 0 }
  0x13   : > { %s3215_s24 = scalar_select %p2874_p6, 1, 0 }
  0x14   : > { %p2879_p8 = pnand %p1923_p5, %p171_p7  ;;  %s183_s27 = sshll.u32 %s2789_s26, 4  ;;  %s2883_s27 = int_to_ptr.vmem [resolvable:$true] %s183_s27 }
  0x15   : > { %s2790_s29 = smov [#allocation8]   ;;  %s3218_s2 = sld [smem:[#allocation19_spill]] }
  0x16   : > { %s3216_s25 = scalar_select %p2879_p8, 1, 0 }
  0x17   : > { %p2221_p9 = pneg %p2879_p8  ;;  %s196_s30 = sshll.u32 %s2790_s29, 4  ;;  %s2894_s30 = int_to_ptr.vmem [resolvable:$true] %s196_s30 }
  0x19   : > { %p2890_p11 = pnand %p2221_p9, %p3204_p1 }
  0x1b   : > { %s2576_s7 = scalar_lea.hbm %s3218_s2, 20480  ;;  %p2578_p13 = pneg %p2890_p11 }
  0x1c   : > { %p2577_p12 = scmp.ne.s32.totalorder %s3218_s2, %s2576_s7  ;;  %p2583_p5 = scmp.lt.u32.totalorder %s2576_s7, %s3218_s2 }
  0x1e   : > { %p2579_p0 = pnand %p2578_p13, %p2577_p12 }
  0x20   : > { %p2580_p3 = pneg %p2579_p0 }
  0x22   : > { %p2585_p7 = pnand %p2583_p5, %p2580_p3 }
  0x24   : > { %2588 = shalt.err (!%p2585_p7)
}
  0x25   : > { %s2589_s12 = scalar_lea.vmem %s2883_s27, 20480  ;;  %p2597_p2 = scmp.lt.s32.totalorder %s2883_s27, %s2883_s27 }
  0x26   : > { %p2590_p9 = scmp.ne.s32.totalorder %s2883_s27, %s2589_s12  ;;  %p2598_p12 = scmp.lt.s32.totalorder %s2589_s12, %s2589_s12 }
  0x28   : > { %p2592_p10 = pnand %p2590_p9, %p2578_p13  ;;  %p2599_p0 = por %p2598_p12, %p2597_p2 }
  0x2a   : > { %p2593_p1 = pneg %p2592_p10 }
  0x2c   : > { %p2600_p6 = pnand %p2599_p0, %p2593_p1 }
  0x2e   : > { %2603 = shalt.err (!%p2600_p6)
}
  0x2f   : > { %s2791_s13 = smov 256   ;;  %s2792_s14 = smov 16  }
  0x30   : > { %2224 = dma.hbm_to_vmem [thread:$0]  (!%p2890_p11), %s3218_s2, 20480, %s2883_s27, [#allocation6], %s2791_s13, %s2791_s13, %s2792_s14  }
  0x31   : > { %s3219_s3 = sld [smem:[#allocation20_spill]] }
  0x37   : > { %s2604_s6 = scalar_lea.hbm %s3219_s3, 4096 }
  0x38   : > { %p2605_p2 = scmp.ne.s32.totalorder %s3219_s3, %s2604_s6  ;;  %p2611_p10 = scmp.lt.u32.totalorder %s2604_s6, %s3219_s3 }
  0x3a   : > { %p2607_p1 = pnand %p2605_p2, %p2578_p13 }
  0x3c   : > { %p2608_p6 = pneg %p2607_p1 }
  0x3e   : > { %p2613_p3 = pnand %p2611_p10, %p2608_p6 }
  0x40   : > { %2616 = shalt.err (!%p2613_p3)
}
  0x41   : > { %s2617_s27 = scalar_lea.vmem %s2894_s30, 4096  ;;  %p2625_p12 = scmp.lt.s32.totalorder %s2894_s30, %s2894_s30 }
  0x42   : > { %p2618_p5 = scmp.ne.s32.totalorder %s2894_s30, %s2617_s27  ;;  %p2626_p0 = scmp.lt.s32.totalorder %s2617_s27, %s2617_s27 }
  0x44   : > { %p2620_p7 = pnand %p2618_p5, %p2578_p13  ;;  %p2627_p2 = por %p2626_p0, %p2625_p12 }
  0x46   : > { %p2621_p9 = pneg %p2620_p7 }
  0x48   : > { %p2628_p1 = pnand %p2627_p2, %p2621_p9 }
  0x4a   : > { %2631 = shalt.err (!%p2628_p1)
}
  0x4b   : > { %s3206_s11 = smov 128   ;;  %s2794_s12 = smov 8  }
  0x4c   : > { %2227 = dma.hbm_to_vmem [thread:$0]  (!%p2890_p11), %s3219_s3, 4096, %s2894_s30, [#allocation9], %s3206_s11, %s3206_s11, %s2794_s12  }
  0x4d   : > { %s36_s22 = sadd.s32 1, %s2783_s19  ;;  %s45_s26 = sadd.s32 1, %s2775_s17 }
  0x4e   : > { %p38_p13 = scmp.ge.s32.totalorder %s36_s22, 2  ;;  %p52_p6 = scmp.ne.s32.totalorder %s2775_s17, %s2771_s16 }
  0x4f   : > { %p53_p10 = scmp.eq.s32.totalorder %s2787_s20, 0  ;;  %p2241_p3 = scmp.lt.s32.totalorder %s2787_s20, 2 }
  0x50   : > { %s3246_s22 = smov (%p38_p13, %s36_s22), 0  ;;  %p3221_p7 = scmp.eq.s32.totalorder %s2860_s21, 1 }
  0x51   : > { %3220 = sst [smem:[#allocation16_spill]] %s3246_s22  ;;  %p54_p5 = por %p53_p10, %p52_p6 }
  0x52   : > { %p2961_p9 = por %p3221_p7, %p52_p6  ;;  %s40_s29 = ssub.s32 %s2783_s19, %s3246_s22 }
  0x53   : > { %s2968_s30 = sand.u32 1, %s2775_s17   ;;  %p43_p11 = scmp.eq.s32.totalorder %s40_s29, 0 }
  0x54   : > { %s3222_s28 = scalar_select %p2961_p9, 1, 0 }
  0x55   : > { %s1927_s5 = sshll.u32 %s2968_s30, 4  ;;  %s3205_s6 = smul.u32 384, %s2783_s19 }
  0x56   : > { %s2973_s7 = scalar_select %p43_p11, %s2775_s17, %s45_s26  }
  0x57   : > { %s3224_s0 = sld [smem:[#allocation18_spill]]  ;;  %s214_s27 = scalar_lea.vmem [#allocation2], %s1927_s5 }
  0x58   : > { %3223 = sst [smem:[#allocation17_spill]] %s2973_s7  ;;  %s231_s13 = sshll.u32 %s214_s27, 4  ;;  %s2988_s13 = int_to_ptr.vmem [resolvable:$true] %s231_s13 }
  0x59   : > { %p2984_p12 = pnand %p2241_p3, %p54_p5  ;;  %s211_s29 = scalar_lea.sflag [#allocation3], %s2968_s30 }
  0x5b   : > { %p2634_p2 = pneg %p2984_p12 }
  0x5d   : > { %s2980_s10 = scalar_lea.hbm %s3224_s0, %s3205_s6  ;;  %s2637_s27 = scalar_lea.hbm %s3224_s0, 768 }
  0x5e   : > { %s2632_s8 = scalar_lea.hbm %s2980_s10, 256  ;;  %p2638_p6 = scmp.lt.u32.totalorder %s2980_s10, %s3224_s0 }
  0x5f   : > { %p2633_p0 = scmp.ne.s32.totalorder %s2980_s10, %s2632_s8  ;;  %p2639_p10 = scmp.lt.u32.totalorder %s2637_s27, %s2632_s8 }
  0x60   : > { %p2641_p5 = scmp.lt.u32.totalorder %s2632_s8, %s2980_s10 }
  0x61   : > { %p2635_p1 = pnand %p2634_p2, %p2633_p0  ;;  %p2640_p3 = por %p2639_p10, %p2638_p6 }
  0x63   : > { %p2636_p13 = pneg %p2635_p1  ;;  %p2642_p7 = por %p2641_p5, %p2640_p3 }
  0x65   : > { %p2643_p11 = pnand %p2642_p7, %p2636_p13 }
  0x67   : > { %2646 = shalt.err (!%p2643_p11)
}
  0x68   : > { %s2647_s26 = scalar_lea.vmem %s2988_s13, 256  ;;  %s2795_s5 = smov [#allocation2]  }
  0x69   : > { %p2648_p0 = scmp.ne.s32.totalorder %s2988_s13, %s2647_s26  ;;  %s2652_s9 = sshll.u32 %s2795_s5, 4  ;;  %s2653_s9 = int_to_ptr.vmem [resolvable:$false] %s2652_s9 }
  0x6a   : > { %s2654_s11 = scalar_lea.vmem %s2653_s9, 512  ;;  %p2655_p4 = scmp.lt.s32.totalorder %s2988_s13, %s2653_s9 }
  0x6b   : > { %p2650_p1 = pnand %p2648_p0, %p2634_p2  ;;  %p2656_p6 = scmp.lt.s32.totalorder %s2654_s11, %s2647_s26 }
  0x6d   : > { %p2651_p9 = pneg %p2650_p1  ;;  %p2657_p10 = por %p2656_p6, %p2655_p4 }
  0x6f   : > { %p2658_p3 = pnand %p2657_p10, %p2651_p9 }
  0x71   : > { %2661 = shalt.err (!%p2658_p3)
}
  0x72   : > { %s3226_s6 = smov 128   ;;  %s1929_s8 = sshll.u32 %s2968_s30, 3 }
  0x73   : > { %2231 = dma.hbm_to_vmem [thread:$0]  (!%p2984_p12), %s2980_s10, 256, %s2988_s13, %s211_s29, %s3226_s6, %s3226_s6, %s2794_s12  }
  0x74   : > { %s3227_s27 = smul.u32 384, %s2783_s19  ;;  %s245_s0 = scalar_lea.vmem [#allocation5], %s1929_s8 }
  0x75   : > { %s257_s2 = sshll.u32 %s245_s0, 4  ;;  %s3228_s3 = sand.u32 1, %s2787_s20   ;;  %s258_s2 = int_to_ptr.vmem [resolvable:$true] %s257_s2 }
  0x76   : > { %s1834_s9 = scalar_lea.hbm %s3200_s1, %s3227_s27  ;;  %s242_s22 = scalar_lea.sflag [#allocation6], %s3228_s3 }
  0x77   : > { %s3028_s11 = scalar_lea.hbm %s1834_s9, 256  ;;  %s2692_s7 = scalar_lea.hbm %s1834_s9, 384 }
  0x78   : > { %p2663_p4 = scmp.ne.s32.totalorder %s3028_s11, %s2692_s7  ;;  %s2667_s10 = scalar_lea.hbm %s3200_s1, 768 }
  0x79   : > { %p2668_p5 = scmp.lt.u32.totalorder %s3028_s11, %s3200_s1  ;;  %p2669_p7 = scmp.lt.u32.totalorder %s2667_s10, %s2692_s7 }
  0x7a   : > { %p2665_p9 = pnand %p2663_p4, %p2634_p2  ;;  %p2671_p0 = scmp.lt.u32.totalorder %s2692_s7, %s3028_s11 }
  0x7b   : > { %p2670_p11 = por %p2669_p7, %p2668_p5 }
  0x7c   : > { %p2666_p13 = pneg %p2665_p9 }
  0x7d   : > { %p2672_p1 = por %p2671_p0, %p2670_p11 }
  0x7f   : > { %p2673_p6 = pnand %p2672_p1, %p2666_p13 }
  0x81   : > { %2676 = shalt.err (!%p2673_p6)
}
  0x82   : > { %s2677_s0 = scalar_lea.vmem %s258_s2, 128  ;;  %s2796_s3 = smov [#allocation5]  }
  0x83   : > { %p2678_p10 = scmp.ne.s32.totalorder %s258_s2, %s2677_s0  ;;  %s2682_s6 = sshll.u32 %s2796_s3, 4  ;;  %s2683_s6 = int_to_ptr.vmem [resolvable:$false] %s2682_s6 }
  0x84   : > { %s2684_s8 = scalar_lea.vmem %s2683_s6, 256  ;;  %p2685_p9 = scmp.lt.s32.totalorder %s258_s2, %s2683_s6 }
  0x85   : > { %p2680_p3 = pnand %p2678_p10, %p2634_p2  ;;  %p2686_p8 = scmp.lt.s32.totalorder %s2684_s8, %s2677_s0 }
  0x87   : > { %p2681_p4 = pneg %p2680_p3  ;;  %p2687_p5 = por %p2686_p8, %p2685_p9 }
  0x89   : > { %p2688_p7 = pnand %p2687_p5, %p2681_p4 }
  0x8b   : > { %2691 = shalt.err (!%p2688_p7)
}
  0x8c   : > { %2234 = dma.hbm_to_vmem [thread:$0]  (!%p2984_p12), %s3028_s11, 128, %s258_s2, %s242_s22  }
  0x8d   : > { %p3229_p13 = scmp.ne.s32.totalorder %s3216_s25, 0 }
  0x8e   : > { %s3053_s7 = sand.u32 (!%p3229_p13), 1, %s2771_s16   ;;  %p3230_p8 = scmp.ne.s32.totalorder (!%p3229_p13), %s3214_s23, 0 }
  0x8f   : > { %266 = sbr.rel (%p3229_p13) target bundleno = 837 (0x345), region = 36  ;;  %s1932_s27 = sshll.u32 (!%p3229_p13), %s3053_s7, 4 }
  0x90   : > { %s269_s26 = scalar_lea.sflag (!%p3229_p13), [#allocation3], %s3053_s7  ;;  %s272_s5 = scalar_lea.vmem (!%p3229_p13), [#allocation2], %s1932_s27 }
  0x96   : > { %2746 = dma.done.wait (%p3230_p8), %s269_s26, 256  }
  0x97   : > { %2748 = vsyncadd (%p3230_p8), %s269_s26, 4294967040  ;;  %s277_s2 = sand.u32 1, %s2860_s21   ;;  %s1933_s25 = sshll.u32 %s3053_s7, 3 }
  0x98   : > { %s278_s22 = scalar_lea.sflag [#allocation6], %s277_s2  ;;  %s281_s14 = scalar_lea.vmem [#allocation5], %s1933_s25 }
  0x99   : > { %2750 = dma.done.wait (%p3230_p8), %s278_s22, 128  }
  0x9a   : > { %2752 = vsyncadd (%p3230_p8), %s278_s22, 4294967168  ;;  %p3231_p12 = scmp.eq.s32.totalorder %s2860_s21, 0 }
  0x9c   : > { %2754 = dma.done.wait (%p3231_p12), [#allocation6], 20480   ;;  %p3232_p2 = pmov %p3231_p12 }
  0x9e   : > { %2756 = vsyncadd (%p3232_p2), [#allocation6], 4294946816  ;;  %p3233_p11 = pmov %p3232_p2 }
  0x9f   : > { %p3234_p0 = pmov %p3232_p2 }
  0xa0   : > { %2758 = dma.done.wait (%p3233_p11), [#allocation9], 4096  }
  0xa1   : > { %2760 = vsyncadd (%p3234_p0), [#allocation9], 4294963200  ;;  %v330_v0 = vld [vmem:[%s272_s5 + $0x8] sm:$0xff]  ;;  %v335_v1 = vld [vmem:[%s281_s14] sm:$0xff]  ;;  %vm370_vm0 = vcmask 1045504   ;;  %vm344_vm1 = vcmask 1046528  }
  0xa2   : > { %v329_v2 = vld [vmem:[%s272_s5] sm:$0xff]  ;;  %v3077_v3 = vunpack.c.l.bf16 %v330_v0  ;;  %v3079_v4 = vunpack.c.h.bf16 %v330_v0  ;;  %v3081_v5 = vunpack.c.l.bf16 %v335_v1  ;;  %v3083_v6 = vunpack.c.h.bf16 %v335_v1  ;;  %v2337_v10 = vld [vmem:[#allocation7 + $0xc] ss:$16 sps:$4 sm:$0xff]   ;;  %v2340_v21 = vld [vmem:[#allocation7 + $0x8] ss:$16 sps:$4 sm:$0xff]   ;;  %s2797_s21 = smov 64  }
  0xa3   : > { %v2335_v7 = vld [vmem:[#allocation7 + $0x4] ss:$16 sps:$4 sm:$0xff]   ;;  %v331_v8 = vunpack.c.l.bf16 %v329_v2  ;;  %v3085_v9 = vunpack.c.h.bf16 %v329_v2  ;;  %vm396_vm2 = vcmask 1044480   ;;  %v3087_v11 = vcombine.low %v329_v2, %v330_v0  ;;  %v2339_v16 = vld [vmem:[#allocation7] ss:$16 sps:$4 sm:$0xff]   ;;  %1522 = vmatprep.subr.bf16.mxu1 %v2337_v10  ;;  %s2798_s23 = smov 32  }
  0xa4   : > { %v372_v12 = vrot.slane %v3077_v3, 2  ;;  %v375_v13 = vrot.slane %v3079_v4, 2  ;;  %v377_v14 = vrot.slane %v3081_v5, 2  ;;  %v379_v15 = vrot.slane %v3083_v6, 2  ;;  %1393 = vmatprep.subr.bf16.mxu0 %v2335_v7  ;;  %v2341_v26 = vld [vmem:[#allocation7 + $0x24] ss:$16 sps:$4 sm:$0xff]   ;;  %1523 = vmatpush1.bf16.msra.mxu1 %v2340_v21 }
  0xa5   : > { %v345_v17 = vrot.slane %v331_v8, 1  ;;  %v346_v18 = vrot.slane %v3077_v3, 1  ;;  %v351_v19 = vrot.slane %v3081_v5, 1  ;;  %v348_v20 = vrot.slane %v3085_v9, 1  ;;  %1394 = vmatpush1.bf16.msra.mxu0 %v2339_v16  ;;  %v2343_v31 = vld [vmem:[#allocation7 + $0x2c] ss:$16 sps:$4 sm:$0xff]  }
  0xa6   : > { %v378_v22 = vsel %vm370_vm0, %v372_v12, %v377_v14  ;;  %v380_v23 = vsel %vm370_vm0, %v375_v13, %v379_v15  ;;  %v349_v24 = vrot.slane %v3079_v4, 1  ;;  %v353_v25 = vrot.slane %v3083_v6, 1  ;;  %1395 = vmatprep.subr.bf16.mxu0 %v2341_v26  ;;  %v2345_v36 = vld [vmem:[#allocation7 + $0x20] ss:$16 sps:$4 sm:$0xff]   ;;  %v2346_v37 = vld [vmem:[#allocation7 + $0x28] ss:$16 sps:$4 sm:$0xff]   ;;  %1524 = vmatprep.subr.bf16.mxu1 %v2343_v31 }
  0xa7   : > { %v2315_v27 = vpack.i.bf16 %v380_v23, %v378_v22  ;;  %v347_v28 = vsel %vm344_vm1, %v345_v17, %v346_v18  ;;  %v352_v29 = vsel %vm344_vm1, %v346_v18, %v351_v19  ;;  %v371_v30 = vrot.slane %v331_v8, 2  ;;  %v2347_v42 = vld [vmem:[#allocation7 + $0x44] ss:$16 sps:$4 sm:$0xff]   ;;  %v2349_v45 = vld [vmem:[#allocation7 + $0x4c] ss:$16 sps:$4 sm:$0xff]   ;;  %s2799_s9 = smov 96  }
  0xa8   : > { %v2305_v32 = vpack.i.bf16 %v352_v29, %v347_v28  ;;  %v350_v33 = vsel %vm344_vm1, %v348_v20, %v349_v24  ;;  %v354_v34 = vsel %vm344_vm1, %v349_v24, %v353_v25  ;;  %v374_v35 = vrot.slane %v3085_v9, 2  ;;  %1525 = vmatpush1.bf16.msra.mxu1 %v2346_v37  ;;  %v2351_v51 = vld [vmem:[#allocation7 + $0x40] ss:$16 sps:$4 sm:$0xff]   ;;  %v2352_v52 = vld [vmem:[#allocation7 + $0x48] ss:$16 sps:$4 sm:$0xff]   ;;  %s318_s11 = scalar_lea.vmem [#allocation10], %s1932_s27 }
  0xa9   : > { %2316 = vrot.lane.b32.xlu1 %v2315_v27, %s2797_s21  ;;  %v2320_v38 = vpack.i.bf16 %v354_v34, %v350_v33  ;;  %v373_v39 = vsel %vm370_vm0, %v371_v30, %v372_v12  ;;  %v397_v40 = vrot.slane %v331_v8, 3  ;;  %v398_v41 = vrot.slane %v3077_v3, 3  ;;  %1396 = vmatpush1.bf16.msra.mxu0 %v2345_v36  ;;  %v2353_v55 = vld [vmem:[#allocation7 + $0x64] ss:$16 sps:$4 sm:$0xff]   ;;  %v2355_v57 = vld [vmem:[#allocation7 + $0x6c] ss:$16 sps:$4 sm:$0xff]  }
  0xaa   : > { %2306 = vrot.lane.b32.xlu0 %v2305_v32, %s2798_s23  ;;  %v376_v43 = vsel %vm370_vm0, %v374_v35, %v375_v13  ;;  %v403_v44 = vrot.slane %v3081_v5, 3  ;;  %v400_v46 = vrot.slane %v3085_v9, 3  ;;  %v401_v47 = vrot.slane %v3079_v4, 3  ;;  %1397 = vmatprep.subr.bf16.mxu0 %v2347_v42  ;;  %v2357_v58 = vld [vmem:[#allocation7 + $0x60] ss:$16 sps:$4 sm:$0xff]   ;;  %s1788_s12 = sshll.u32 %s318_s11, 4  ;;  %s3145_s12 = int_to_ptr.vmem [resolvable:$true] %s1788_s12 }
  0xab   : > { %v2310_v48 = vpack.i.bf16 %v376_v43, %v373_v39  ;;  %v399_v49 = vsel %vm396_vm2, %v397_v40, %v398_v41  ;;  %v405_v50 = vrot.slane %v3083_v6, 3  ;;  %1526 = vmatprep.subr.bf16.mxu1 %v2349_v45  ;;  %v2358_v61 = vld [vmem:[#allocation7 + $0x68] ss:$16 sps:$4 sm:$0xff]   ;;  %v2359_v62 = vld [vmem:[#allocation7 + $0x84] ss:$16 sps:$4 sm:$0xff]   ;;  %vm363_vm3 = vcmask 261120  }
  0xac   : > { %v404_v53 = vsel %vm396_vm2, %v398_v41, %v403_v44  ;;  %v402_v54 = vsel %vm396_vm2, %v400_v46, %v401_v47  ;;  %1527 = vmatpush1.bf16.msra.mxu1 %v2352_v52  ;;  %v2361_v63 = vld [vmem:[#allocation7 + $0x8c] ss:$16 sps:$4 sm:$0xff]   ;;  %v2363_v0 = vld [vmem:[#allocation7 + $0x80] ss:$16 sps:$4 sm:$0xff]   ;;  %v2364_v1 = vld [vmem:[#allocation7 + $0x88] ss:$16 sps:$4 sm:$0xff]  }
  0xad   : > { %2321 = vrot.lane.b32.xlu1 %v2320_v38, %s2798_s23  ;;  %v406_v56 = vsel %vm396_vm2, %v401_v47, %v405_v50  ;;  %v2325_v59 = vpack.i.bf16 %v404_v53, %v399_v49  ;;  %1398 = vmatpush1.bf16.msra.mxu0 %v2351_v51  ;;  %v2365_v2 = vld [vmem:[#allocation7 + $0xa4] ss:$16 sps:$4 sm:$0xff]   ;;  %v2367_v3 = vld [vmem:[#allocation7 + $0xac] ss:$16 sps:$4 sm:$0xff]   ;;  %v2369_v5 = vld [vmem:[#allocation7 + $0xa0] ss:$16 sps:$4 sm:$0xff]  }
  0xae   : > { %2311 = vrot.lane.b32.xlu0 %v2310_v48, %s2797_s21  ;;  %v2330_v60 = vpack.i.bf16 %v406_v56, %v402_v54  ;;  %1399 = vmatprep.subr.bf16.mxu0 %v2353_v55  ;;  %v2370_v6 = vld [vmem:[#allocation7 + $0xa8] ss:$16 sps:$4 sm:$0xff]   ;;  %v2371_v7 = vld [vmem:[#allocation7 + $0xc4] ss:$16 sps:$4 sm:$0xff]   ;;  %v2373_v8 = vld [vmem:[#allocation7 + $0xcc] ss:$16 sps:$4 sm:$0xff]  }
  0xaf   : > { %1528 = vmatprep.subr.bf16.mxu1 %v2355_v57  ;;  %v2375_v10 = vld [vmem:[#allocation7 + $0xc0] ss:$16 sps:$4 sm:$0xff]   ;;  %v2376_v12 = vld [vmem:[#allocation7 + $0xc8] ss:$16 sps:$4 sm:$0xff]   ;;  %v2377_v13 = vld [vmem:[#allocation7 + $0xe4] ss:$16 sps:$4 sm:$0xff]  }
  0xb0   : > { %1529 = vmatpush1.bf16.msra.mxu1 %v2358_v61  ;;  %v2379_v14 = vld [vmem:[#allocation7 + $0xec] ss:$16 sps:$4 sm:$0xff]   ;;  %v2381_v15 = vld [vmem:[#allocation7 + $0xe0] ss:$16 sps:$4 sm:$0xff]   ;;  %v2382_v16 = vld [vmem:[#allocation7 + $0xe8] ss:$16 sps:$4 sm:$0xff]  }
  0xb1   : > { %2331 = vrot.lane.b32.xlu1 %v2330_v60, %s2799_s9  ;;  %1400 = vmatpush1.bf16.msra.mxu0 %v2357_v58  ;;  %v2383_v17 = vld [vmem:[#allocation7 + $0x104] ss:$16 sps:$4 sm:$0xff]   ;;  %v2385_v18 = vld [vmem:[#allocation7 + $0x10c] ss:$16 sps:$4 sm:$0xff]   ;;  %v2387_v19 = vld [vmem:[#allocation7 + $0x100] ss:$16 sps:$4 sm:$0xff]  }
  0xb2   : > { %2326 = vrot.lane.b32.xlu0 %v2325_v59, %s2799_s9  ;;  %1401 = vmatprep.subr.bf16.mxu0 %v2359_v62  ;;  %v2388_v20 = vld [vmem:[#allocation7 + $0x108] ss:$16 sps:$4 sm:$0xff]   ;;  %v2389_v21 = vld [vmem:[#allocation7 + $0x124] ss:$16 sps:$4 sm:$0xff]   ;;  %v2391_v22 = vld [vmem:[#allocation7 + $0x12c] ss:$16 sps:$4 sm:$0xff]  }
  0xb3   : > { %1530 = vmatprep.subr.bf16.mxu1 %v2361_v63  ;;  %v2393_v23 = vld [vmem:[#allocation7 + $0x120] ss:$16 sps:$4 sm:$0xff]   ;;  %v2394_v24 = vld [vmem:[#allocation7 + $0x128] ss:$16 sps:$4 sm:$0xff]   ;;  %v2395_v25 = vld [vmem:[#allocation7 + $0x144] ss:$16 sps:$4 sm:$0xff]  }
  0xb4   : > { %1531 = vmatpush1.bf16.msra.mxu1 %v2364_v1  ;;  %v2397_v26 = vld [vmem:[#allocation7 + $0x14c] ss:$16 sps:$4 sm:$0xff]   ;;  %v2399_v27 = vld [vmem:[#allocation7 + $0x140] ss:$16 sps:$4 sm:$0xff]   ;;  %v2400_v28 = vld [vmem:[#allocation7 + $0x148] ss:$16 sps:$4 sm:$0xff]  }
  0xb5   : > { %1402 = vmatpush1.bf16.msra.mxu0 %v2363_v0  ;;  %1532 = vmatprep.subr.bf16.mxu1 %v2367_v3  ;;  %v2401_v29 = vld [vmem:[#allocation7 + $0x164] ss:$16 sps:$4 sm:$0xff]   ;;  %v2403_v30 = vld [vmem:[#allocation7 + $0x16c] ss:$16 sps:$4 sm:$0xff]   ;;  %v2405_v31 = vld [vmem:[#allocation7 + $0x160] ss:$16 sps:$4 sm:$0xff]  }
  0xb6   : > { %1403 = vmatprep.subr.bf16.mxu0 %v2365_v2  ;;  %v2406_v32 = vld [vmem:[#allocation7 + $0x168] ss:$16 sps:$4 sm:$0xff]   ;;  %v2407_v33 = vld [vmem:[#allocation7 + $0x184] ss:$16 sps:$4 sm:$0xff]   ;;  %v2409_v34 = vld [vmem:[#allocation7 + $0x18c] ss:$16 sps:$4 sm:$0xff]  }
  0xb7   : > { %v2411_v35 = vld [vmem:[#allocation7 + $0x180] ss:$16 sps:$4 sm:$0xff]   ;;  %v2412_v36 = vld [vmem:[#allocation7 + $0x188] ss:$16 sps:$4 sm:$0xff]   ;;  %v2413_v37 = vld [vmem:[#allocation7 + $0x1a4] ss:$16 sps:$4 sm:$0xff]  }
  0xb8   : > { %1533 = vmatpush1.bf16.msra.mxu1 %v2370_v6  ;;  %v2415_v38 = vld [vmem:[#allocation7 + $0x1ac] ss:$16 sps:$4 sm:$0xff]   ;;  %v2417_v39 = vld [vmem:[#allocation7 + $0x1a0] ss:$16 sps:$4 sm:$0xff]   ;;  %v2418_v40 = vld [vmem:[#allocation7 + $0x1a8] ss:$16 sps:$4 sm:$0xff]  }
  0xb9   : > { %1404 = vmatpush1.bf16.msra.mxu0 %v2369_v5  ;;  %1534 = vmatprep.subr.bf16.mxu1 %v2373_v8  ;;  %v2419_v41 = vld [vmem:[#allocation7 + $0x1c4] ss:$16 sps:$4 sm:$0xff]   ;;  %v2421_v42 = vld [vmem:[#allocation7 + $0x1cc] ss:$16 sps:$4 sm:$0xff]   ;;  %v2423_v43 = vld [vmem:[#allocation7 + $0x1c0] ss:$16 sps:$4 sm:$0xff]  }
  0xba   : > { %1405 = vmatprep.subr.bf16.mxu0 %v2371_v7  ;;  %v2424_v44 = vld [vmem:[#allocation7 + $0x1c8] ss:$16 sps:$4 sm:$0xff]   ;;  %v2425_v45 = vld [vmem:[#allocation7 + $0x1e4] ss:$16 sps:$4 sm:$0xff]   ;;  %v2427_v46 = vld [vmem:[#allocation7 + $0x1ec] ss:$16 sps:$4 sm:$0xff]  }
  0xbb   : > { %v2429_v47 = vld [vmem:[#allocation7 + $0x1e0] ss:$16 sps:$4 sm:$0xff]   ;;  %v2430_v48 = vld [vmem:[#allocation7 + $0x1e8] ss:$16 sps:$4 sm:$0xff]   ;;  %v2433_v49 = vld [vmem:[#allocation7 + $0x204] ss:$16 sps:$4 sm:$0xff]  }
  0xbc   : > { %1535 = vmatpush1.bf16.msra.mxu1 %v2376_v12  ;;  %v2436_v50 = vld [vmem:[#allocation7 + $0x20c] ss:$16 sps:$4 sm:$0xff]   ;;  %vm389_vm4 = vcmask 523264   ;;  %v2431_v0 = vld [vmem:[#allocation7 + $0x200] ss:$16 sps:$4 sm:$0xff]   ;;  %vm415_vm5 = vcmask 785408  }
  0xbd   : > { %1406 = vmatpush1.bf16.msra.mxu0 %v2375_v10  ;;  %1536 = vmatprep.subr.bf16.mxu1 %v2379_v14  ;;  %v2434_v1 = vld [vmem:[#allocation7 + $0x208] ss:$16 sps:$4 sm:$0xff]   ;;  %v2440_v5 = vld [vmem:[#allocation7 + $0x224] ss:$16 sps:$4 sm:$0xff]   ;;  %v2443_v6 = vld [vmem:[#allocation7 + $0x22c] ss:$16 sps:$4 sm:$0xff]  }
  0xbe   : > { %1407 = vmatprep.subr.bf16.mxu0 %v2377_v13  ;;  %s2103_s30 = sshll.u32 %s2779_s18, 8  ;;  %s1773_s0 = scalar_lea.sflag [#allocation4], %s3053_s7 }
  0xbf   : > { %s3150_s29 = scalar_lea.hbm %s3203_s4, %s2103_s30  ;;  %s2693_s3 = scalar_lea.vmem %s3145_s12, 256 }
  0xc0   : > { %1537 = vmatpush1.bf16.msra.mxu1 %v2382_v16  ;;  %v2441_v16 = vld [vmem:[#allocation7 + $0x228] ss:$16 sps:$4 sm:$0xff]   ;;  %p2694_p1 = scmp.ne.s32.totalorder %s3145_s12, %s2693_s3  ;;  %p3235_p6 = scmp.ne.s32.totalorder %s3222_s28, 0 }
  0xc1   : > { %1408 = vmatpush1.bf16.msra.mxu0 %v2381_v15  ;;  %1538 = vmatprep.subr.bf16.mxu1 %v2385_v18  ;;  %v2438_v15 = vld [vmem:[#allocation7 + $0x220] ss:$16 sps:$4 sm:$0xff]   ;;  %s2801_s18 = smov [#allocation10]  }
  0xc2   : > { %1409 = vmatprep.subr.bf16.mxu0 %v2383_v17  ;;  %p2695_p10 = pnand %p2694_p1, %p3235_p6  ;;  %s2697_s6 = sshll.u32 %s2801_s18, 4  ;;  %s2698_s6 = int_to_ptr.vmem [resolvable:$false] %s2697_s6 }
  0xc3   : > { %s2699_s8 = scalar_lea.vmem %s2698_s6, 512  ;;  %p2700_p4 = scmp.lt.s32.totalorder %s3145_s12, %s2698_s6 }
  0xc4   : > { %1539 = vmatpush1.bf16.msra.mxu1 %v2388_v20  ;;  %v2446_v20 = vld [vmem:[#allocation7 + $0x244] ss:$16 sps:$4 sm:$0xff]   ;;  %p2696_p3 = pneg %p2695_p10  ;;  %p2701_p9 = scmp.lt.s32.totalorder %s2699_s8, %s2693_s3 }
  0xc5   : > { %1410 = vmatpush1.bf16.msra.mxu0 %v2387_v19  ;;  %1540 = vmatprep.subr.bf16.mxu1 %v2391_v22 }
  0xc6   : > { %1411 = vmatprep.subr.bf16.mxu0 %v2389_v21  ;;  %v2449_v21 = vld [vmem:[#allocation7 + $0x24c] ss:$16 sps:$4 sm:$0xff]   ;;  %p2702_p5 = por %p2701_p9, %p2700_p4 }
  0xc8   : > { %1541 = vmatpush1.bf16.msra.mxu1 %v2394_v24  ;;  %p2703_p7 = pnand %p2702_p5, %p2696_p3 }
  0xc9   : > { %1412 = vmatpush1.bf16.msra.mxu0 %v2393_v23  ;;  %1542 = vmatprep.subr.bf16.mxu1 %v2397_v26 }
  0xca   : > { %1413 = vmatprep.subr.bf16.mxu0 %v2395_v25 }
  0xcc   : > { %1543 = vmatpush1.bf16.msra.mxu1 %v2400_v28  ;;  %v2447_v28 = vld [vmem:[#allocation7 + $0x248] ss:$16 sps:$4 sm:$0xff]  }
  0xcd   : > { %1414 = vmatpush1.bf16.msra.mxu0 %v2399_v27  ;;  %1544 = vmatprep.subr.bf16.mxu1 %v2403_v30  ;;  %v2444_v27 = vld [vmem:[#allocation7 + $0x240] ss:$16 sps:$4 sm:$0xff]  }
  0xce   : > { %1415 = vmatprep.subr.bf16.mxu0 %v2401_v29 }
  0xd0   : > { %1545 = vmatpush1.bf16.msra.mxu1 %v2406_v32  ;;  %v2455_v32 = vld [vmem:[#allocation7 + $0x26c] ss:$16 sps:$4 sm:$0xff]  }
  0xd1   : > { %1416 = vmatpush1.bf16.msra.mxu0 %v2405_v31  ;;  %1546 = vmatprep.subr.bf16.mxu1 %v2409_v34  ;;  %v2452_v31 = vld [vmem:[#allocation7 + $0x264] ss:$16 sps:$4 sm:$0xff]   ;;  %v2453_v34 = vld [vmem:[#allocation7 + $0x268] ss:$16 sps:$4 sm:$0xff]  }
  0xd2   : > { %1417 = vmatprep.subr.bf16.mxu0 %v2407_v33  ;;  %v2450_v33 = vld [vmem:[#allocation7 + $0x260] ss:$16 sps:$4 sm:$0xff]  }
  0xd4   : > { %1547 = vmatpush1.bf16.msra.mxu1 %v2412_v36  ;;  %v2461_v36 = vld [vmem:[#allocation7 + $0x28c] ss:$16 sps:$4 sm:$0xff]  }
  0xd5   : > { %1418 = vmatpush1.bf16.msra.mxu0 %v2411_v35  ;;  %1548 = vmatprep.subr.bf16.mxu1 %v2415_v38  ;;  %v2458_v35 = vld [vmem:[#allocation7 + $0x284] ss:$16 sps:$4 sm:$0xff]   ;;  %v2459_v38 = vld [vmem:[#allocation7 + $0x288] ss:$16 sps:$4 sm:$0xff]  }
  0xd6   : > { %1419 = vmatprep.subr.bf16.mxu0 %v2413_v37  ;;  %v2456_v37 = vld [vmem:[#allocation7 + $0x280] ss:$16 sps:$4 sm:$0xff]  }
  0xd8   : > { %1549 = vmatpush1.bf16.msra.mxu1 %v2418_v40  ;;  %v2467_v40 = vld [vmem:[#allocation7 + $0x2ac] ss:$16 sps:$4 sm:$0xff]  }
  0xd9   : > { %1420 = vmatpush1.bf16.msra.mxu0 %v2417_v39  ;;  %1550 = vmatprep.subr.bf16.mxu1 %v2421_v42  ;;  %v2464_v39 = vld [vmem:[#allocation7 + $0x2a4] ss:$16 sps:$4 sm:$0xff]   ;;  %v2465_v42 = vld [vmem:[#allocation7 + $0x2a8] ss:$16 sps:$4 sm:$0xff]  }
  0xda   : > { %1421 = vmatprep.subr.bf16.mxu0 %v2419_v41  ;;  %v2462_v41 = vld [vmem:[#allocation7 + $0x2a0] ss:$16 sps:$4 sm:$0xff]  }
  0xdc   : > { %1551 = vmatpush1.bf16.msra.mxu1 %v2424_v44  ;;  %v2473_v44 = vld [vmem:[#allocation7 + $0x2cc] ss:$16 sps:$4 sm:$0xff]  }
  0xdd   : > { %1422 = vmatpush1.bf16.msra.mxu0 %v2423_v43  ;;  %1552 = vmatprep.subr.bf16.mxu1 %v2427_v46  ;;  %v2470_v43 = vld [vmem:[#allocation7 + $0x2c4] ss:$16 sps:$4 sm:$0xff]   ;;  %v2471_v46 = vld [vmem:[#allocation7 + $0x2c8] ss:$16 sps:$4 sm:$0xff]  }
  0xde   : > { %1423 = vmatprep.subr.bf16.mxu0 %v2425_v45  ;;  %v2468_v45 = vld [vmem:[#allocation7 + $0x2c0] ss:$16 sps:$4 sm:$0xff]  }
  0xe0   : > { %1553 = vmatpush1.bf16.msra.mxu1 %v2430_v48  ;;  %v2479_v48 = vld [vmem:[#allocation7 + $0x2ec] ss:$16 sps:$4 sm:$0xff]  }
  0xe1   : > { %1424 = vmatpush1.bf16.msra.mxu0 %v2429_v47  ;;  %1565 = vmatprep.subr.bf16.mxu1 %v2436_v50  ;;  %v2476_v47 = vld [vmem:[#allocation7 + $0x2e4] ss:$16 sps:$4 sm:$0xff]   ;;  %v2477_v50 = vld [vmem:[#allocation7 + $0x2e8] ss:$16 sps:$4 sm:$0xff]  }
  0xe2   : > { %1436 = vmatprep.subr.bf16.mxu0 %v2433_v49  ;;  %v2474_v49 = vld [vmem:[#allocation7 + $0x2e0] ss:$16 sps:$4 sm:$0xff]  }
 0x11b   : > { %v2317_v51 = vpop.permute.xlu1 %2316 }
 0x11c   : > { %v2307_v52 = vpop.permute.xlu0 %2306  ;;  %v2319_v55 = vunpack.i.h.bf16 %v2317_v51  ;;  %v2318_v56 = vunpack.i.l.bf16 %v2317_v51  ;;  %v2482_v51 = vld [vmem:[#allocation7 + $0x304] ss:$16 sps:$4 sm:$0xff]  }
 0x11d   : > { %v2309_v53 = vunpack.i.h.bf16 %v2307_v52  ;;  %v2308_v54 = vunpack.i.l.bf16 %v2307_v52  ;;  %v2485_v52 = vld [vmem:[#allocation7 + $0x30c] ss:$16 sps:$4 sm:$0xff]  }
 0x11f   : > { %v2322_v57 = vpop.permute.xlu1 %2321  ;;  %v422_v58 = vsel %vm363_vm3, %v3085_v9, %v2308_v54  ;;  %v423_v59 = vsel %vm363_vm3, %v3079_v4, %v2309_v53  ;;  %v391_v9 = vsel %vm389_vm4, %v2318_v56, %v2319_v55  ;;  %v2488_v55 = vld [vmem:[#allocation7 + $0x324] ss:$16 sps:$4 sm:$0xff]  }
 0x120   : > { %v2324_v60 = vunpack.i.h.bf16 %v2322_v57  ;;  %v2323_v61 = vunpack.i.l.bf16 %v2322_v57  ;;  %v2312_v62 = vpop.permute.xlu0 %2311  ;;  %v429_v63 = vpack.c.bf16 %v423_v59, %v422_v58  ;;  %v2486_v57 = vld [vmem:[#allocation7 + $0x320] ss:$16 sps:$4 sm:$0xff]   ;;  %v2489_v58 = vld [vmem:[#allocation7 + $0x328] ss:$16 sps:$4 sm:$0xff]   ;;  %v2494_v59 = vld [vmem:[#allocation7 + $0x344] ss:$16 sps:$4 sm:$0xff]  }
 0x121   : > { %v2314_v2 = vunpack.i.h.bf16 %v2312_v62  ;;  %v2313_v3 = vunpack.i.l.bf16 %v2312_v62  ;;  %v2495_v62 = vld [vmem:[#allocation7 + $0x348] ss:$16 sps:$4 sm:$0xff]  }
 0x122   : > { %v364_v7 = vsel %vm363_vm3, %v2308_v54, %v2323_v61  ;;  %v365_v8 = vsel %vm363_vm3, %v2309_v53, %v2324_v60  ;;  %1425 = vmatprep.mubr.bf16.mxu0 %v429_v63  ;;  %1554 = vmatprep.mubr.bf16.mxu1 %v429_v63  ;;  %v2480_v53 = vld [vmem:[#allocation7 + $0x300] ss:$16 sps:$4 sm:$0xff]   ;;  %v2483_v54 = vld [vmem:[#allocation7 + $0x308] ss:$16 sps:$4 sm:$0xff]   ;;  %v2497_v60 = vld [vmem:[#allocation7 + $0x34c] ss:$16 sps:$4 sm:$0xff]  }
 0x123   : > { %v424_v4 = vsel %vm389_vm4, %v364_v7, %v2313_v3  ;;  %v425_v10 = vsel %vm389_vm4, %v365_v8, %v2318_v56  ;;  %1426 = vmatmul.mubr.bf16.vlgmr.msra.gmra.mrb[0].mxu0 %v3087_v11  ;;  %1555 = vmatmul.mubr.bf16.vlgmr.msra.gmra.mrb[0].mxu1 %v3087_v11  ;;  %v2332_v12 = vpop.permute.xlu1 %2331  ;;  %v390_v13 = vsel %vm389_vm4, %v2313_v3, %v2314_v2  ;;  %v2491_v56 = vld [vmem:[#allocation7 + $0x32c] ss:$16 sps:$4 sm:$0xff]   ;;  %v2492_v61 = vld [vmem:[#allocation7 + $0x340] ss:$16 sps:$4 sm:$0xff]   ;;  %v2500_v63 = vld [vmem:[#allocation7 + $0x364] ss:$16 sps:$4 sm:$0xff]  }
 0x124   : > { %v3130_v14 = vpack.c.bf16 %v425_v10, %v424_v4  ;;  %1437 = vmatpush1.bf16.msra.mxu0 %v2431_v0  ;;  %1566 = vmatpush1.bf16.msra.mxu1 %v2434_v1  ;;  %v2327_v17 = vpop.permute.xlu0 %2326  ;;  %v2334_v18 = vunpack.i.h.bf16 %v2332_v12  ;;  %v2333_v19 = vunpack.i.l.bf16 %v2332_v12  ;;  %v2503_v0 = vld [vmem:[#allocation7 + $0x36c] ss:$16 sps:$4 sm:$0xff]   ;;  %v2498_v1 = vld [vmem:[#allocation7 + $0x360] ss:$16 sps:$4 sm:$0xff]   ;;  %v2501_v2 = vld [vmem:[#allocation7 + $0x368] ss:$16 sps:$4 sm:$0xff]  }
 0x125   : > { %1438 = vmatprep.subr.bf16.mxu0 %v2440_v5  ;;  %1567 = vmatprep.subr.bf16.mxu1 %v2443_v6  ;;  %v2329_v22 = vunpack.i.h.bf16 %v2327_v17  ;;  %v2328_v23 = vunpack.i.l.bf16 %v2327_v17  ;;  %v2506_v3 = vld [vmem:[#allocation7 + $0x384] ss:$16 sps:$4 sm:$0xff]   ;;  %v2509_v5 = vld [vmem:[#allocation7 + $0x38c] ss:$16 sps:$4 sm:$0xff]   ;;  %v2504_v6 = vld [vmem:[#allocation7 + $0x380] ss:$16 sps:$4 sm:$0xff]  }
 0x126   : > { %v2507_v7 = vld [vmem:[#allocation7 + $0x388] ss:$16 sps:$4 sm:$0xff]   ;;  %v2512_v8 = vld [vmem:[#allocation7 + $0x3a4] ss:$16 sps:$4 sm:$0xff]   ;;  %v2510_v4 = vld [vmem:[#allocation7 + $0x3a0] ss:$16 sps:$4 sm:$0xff]  }
 0x127   : > { %v416_v11 = vsel %vm415_vm5, %v2328_v23, %v2333_v19  ;;  %v417_v24 = vsel %vm415_vm5, %v2329_v22, %v2334_v18  ;;  %v426_v25 = vsel %vm415_vm5, %v390_v13, %v2328_v23  ;;  %v427_v26 = vsel %vm415_vm5, %v391_v9, %v2329_v22  ;;  %v2515_v9 = vld [vmem:[#allocation7 + $0x3ac] ss:$16 sps:$4 sm:$0xff]   ;;  %v2513_v10 = vld [vmem:[#allocation7 + $0x3a8] ss:$16 sps:$4 sm:$0xff]   ;;  %v2518_v12 = vld [vmem:[#allocation7 + $0x3c4] ss:$16 sps:$4 sm:$0xff]  }
 0x128   : > { %1439 = vmatpush1.bf16.msra.mxu0 %v2438_v15  ;;  %1568 = vmatpush1.bf16.msra.mxu1 %v2441_v16  ;;  %v3136_v29 = vpack.c.bf16 %v417_v24, %v416_v11  ;;  %v431_v30 = vpack.c.bf16 %v427_v26, %v426_v25  ;;  %v2521_v13 = vld [vmem:[#allocation7 + $0x3cc] ss:$16 sps:$4 sm:$0xff]   ;;  %v2516_v15 = vld [vmem:[#allocation7 + $0x3c0] ss:$16 sps:$4 sm:$0xff]   ;;  %v2519_v16 = vld [vmem:[#allocation7 + $0x3c8] ss:$16 sps:$4 sm:$0xff]  }
 0x129   : > { %1440 = vmatprep.subr.bf16.mxu0 %v2446_v20  ;;  %1569 = vmatprep.subr.bf16.mxu1 %v2449_v21  ;;  %v2524_v17 = vld [vmem:[#allocation7 + $0x3e4] ss:$16 sps:$4 sm:$0xff]   ;;  %v2527_v18 = vld [vmem:[#allocation7 + $0x3ec] ss:$16 sps:$4 sm:$0xff]   ;;  %v2522_v19 = vld [vmem:[#allocation7 + $0x3e0] ss:$16 sps:$4 sm:$0xff]  }
 0x12a   : > { %1468 = vmatprep.mubr.bf16.mxu0 %v431_v30  ;;  %1597 = vmatprep.mubr.bf16.mxu1 %v431_v30  ;;  %v2525_v20 = vld [vmem:[#allocation7 + $0x3e8] ss:$16 sps:$4 sm:$0xff]   ;;  %v2530_v21 = vld [vmem:[#allocation7 + $0x404] ss:$16 sps:$4 sm:$0xff]   ;;  %v2533_v22 = vld [vmem:[#allocation7 + $0x40c] ss:$16 sps:$4 sm:$0xff]  }
 0x12b   : > { %v2528_v23 = vld [vmem:[#allocation7 + $0x400] ss:$16 sps:$4 sm:$0xff]   ;;  %v2531_v11 = vld [vmem:[#allocation7 + $0x408] ss:$16 sps:$4 sm:$0xff]   ;;  %v2536_v24 = vld [vmem:[#allocation7 + $0x424] ss:$16 sps:$4 sm:$0xff]  }
 0x12c   : > { %1441 = vmatpush1.bf16.msra.mxu0 %v2444_v27  ;;  %1570 = vmatpush1.bf16.msra.mxu1 %v2447_v28  ;;  %v2539_v25 = vld [vmem:[#allocation7 + $0x42c] ss:$16 sps:$4 sm:$0xff]   ;;  %v2534_v26 = vld [vmem:[#allocation7 + $0x420] ss:$16 sps:$4 sm:$0xff]   ;;  %v2537_v27 = vld [vmem:[#allocation7 + $0x428] ss:$16 sps:$4 sm:$0xff]  }
 0x12d   : > { %1442 = vmatprep.subr.bf16.mxu0 %v2452_v31  ;;  %1571 = vmatprep.subr.bf16.mxu1 %v2455_v32  ;;  %v2542_v28 = vld [vmem:[#allocation7 + $0x444] ss:$16 sps:$4 sm:$0xff]   ;;  %v2545_v30 = vld [vmem:[#allocation7 + $0x44c] ss:$16 sps:$4 sm:$0xff]   ;;  %v2800_v31 = vmov 0  }
 0x12e   : > { %v2540_v32 = vld [vmem:[#allocation7 + $0x440] ss:$16 sps:$4 sm:$0xff]  }
 0x130   : > { %1443 = vmatpush1.bf16.msra.mxu0 %v2450_v33  ;;  %1572 = vmatpush1.bf16.msra.mxu1 %v2453_v34  ;;  %v2543_v33 = vld [vmem:[#allocation7 + $0x448] ss:$16 sps:$4 sm:$0xff]   ;;  %v2548_v34 = vld [vmem:[#allocation7 + $0x464] ss:$16 sps:$4 sm:$0xff]  }
 0x131   : > { %1444 = vmatprep.subr.bf16.mxu0 %v2458_v35  ;;  %1573 = vmatprep.subr.bf16.mxu1 %v2461_v36  ;;  %v2551_v35 = vld [vmem:[#allocation7 + $0x46c] ss:$16 sps:$4 sm:$0xff]   ;;  %v2549_v36 = vld [vmem:[#allocation7 + $0x468] ss:$16 sps:$4 sm:$0xff]  }
 0x134   : > { %1445 = vmatpush1.bf16.msra.mxu0 %v2456_v37  ;;  %1574 = vmatpush1.bf16.msra.mxu1 %v2459_v38  ;;  %v2554_v37 = vld [vmem:[#allocation7 + $0x484] ss:$16 sps:$4 sm:$0xff]   ;;  %v2557_v38 = vld [vmem:[#allocation7 + $0x48c] ss:$16 sps:$4 sm:$0xff]  }
 0x135   : > { %1446 = vmatprep.subr.bf16.mxu0 %v2464_v39  ;;  %1575 = vmatprep.subr.bf16.mxu1 %v2467_v40  ;;  %v2552_v39 = vld [vmem:[#allocation7 + $0x480] ss:$16 sps:$4 sm:$0xff]   ;;  %v2555_v40 = vld [vmem:[#allocation7 + $0x488] ss:$16 sps:$4 sm:$0xff]  }
 0x138   : > { %1447 = vmatpush1.bf16.msra.mxu0 %v2462_v41  ;;  %1576 = vmatpush1.bf16.msra.mxu1 %v2465_v42  ;;  %v2560_v41 = vld [vmem:[#allocation7 + $0x4a4] ss:$16 sps:$4 sm:$0xff]   ;;  %v2563_v42 = vld [vmem:[#allocation7 + $0x4ac] ss:$16 sps:$4 sm:$0xff]  }
 0x139   : > { %1448 = vmatprep.subr.bf16.mxu0 %v2470_v43  ;;  %1577 = vmatprep.subr.bf16.mxu1 %v2473_v44  ;;  %v2558_v43 = vld [vmem:[#allocation7 + $0x4a0] ss:$16 sps:$4 sm:$0xff]   ;;  %v2561_v44 = vld [vmem:[#allocation7 + $0x4a8] ss:$16 sps:$4 sm:$0xff]  }
 0x13c   : > { %1449 = vmatpush1.bf16.msra.mxu0 %v2468_v45  ;;  %1578 = vmatpush1.bf16.msra.mxu1 %v2471_v46  ;;  %v2566_v45 = vld [vmem:[#allocation7 + $0x4c4] ss:$16 sps:$4 sm:$0xff]   ;;  %v2569_v46 = vld [vmem:[#allocation7 + $0x4cc] ss:$16 sps:$4 sm:$0xff]  }
 0x13d   : > { %1450 = vmatprep.subr.bf16.mxu0 %v2476_v47  ;;  %1579 = vmatprep.subr.bf16.mxu1 %v2479_v48  ;;  %v2564_v47 = vld [vmem:[#allocation7 + $0x4c0] ss:$16 sps:$4 sm:$0xff]   ;;  %v2567_v48 = vld [vmem:[#allocation7 + $0x4c8] ss:$16 sps:$4 sm:$0xff]  }
 0x140   : > { %1451 = vmatpush1.bf16.msra.mxu0 %v2474_v49  ;;  %1580 = vmatpush1.bf16.msra.mxu1 %v2477_v50  ;;  %v2572_v49 = vld [vmem:[#allocation7 + $0x4e4] ss:$16 sps:$4 sm:$0xff]   ;;  %v2575_v50 = vld [vmem:[#allocation7 + $0x4ec] ss:$16 sps:$4 sm:$0xff]  }
 0x141   : > { %1452 = vmatprep.subr.bf16.mxu0 %v2482_v51  ;;  %1581 = vmatprep.subr.bf16.mxu1 %v2485_v52  ;;  %v1679_v51 = vld [vmem:[#allocation8 + $0x80] sm:$0xff]  ;;  %v1680_v52 = vld [vmem:[#allocation8 + $0x88] sm:$0xff] }
 0x144   : > { %1453 = vmatpush1.bf16.msra.mxu0 %v2480_v53  ;;  %1582 = vmatpush1.bf16.msra.mxu1 %v2483_v54  ;;  %v2570_v53 = vld [vmem:[#allocation7 + $0x4e0] ss:$16 sps:$4 sm:$0xff]   ;;  %v2573_v54 = vld [vmem:[#allocation7 + $0x4e8] ss:$16 sps:$4 sm:$0xff]  }
 0x145   : > { %1454 = vmatprep.subr.bf16.mxu0 %v2488_v55  ;;  %1583 = vmatprep.subr.bf16.mxu1 %v2491_v56  ;;  %v2142_v55 = vpack.c.bf16 %v1680_v52, %v1679_v51  ;;  %v1663_v56 = vld [vmem:[#allocation8] sm:$0xff] }
 0x148   : > { %1455 = vmatpush1.bf16.msra.mxu0 %v2486_v57  ;;  %1584 = vmatpush1.bf16.msra.mxu1 %v2489_v58  ;;  %v1664_v57 = vld [vmem:[#allocation8 + $0x8] sm:$0xff]  ;;  %v1681_v58 = vld [vmem:[#allocation8 + $0x90] sm:$0xff] }
 0x149   : > { %1456 = vmatprep.subr.bf16.mxu0 %v2494_v59  ;;  %1585 = vmatprep.subr.bf16.mxu1 %v2497_v60  ;;  %v1682_v59 = vld [vmem:[#allocation8 + $0x98] sm:$0xff]  ;;  %v2144_v60 = vpack.c.bf16 %v1664_v57, %v1663_v56 }
 0x14c   : > { %1457 = vmatpush1.bf16.msra.mxu0 %v2492_v61  ;;  %1586 = vmatpush1.bf16.msra.mxu1 %v2495_v62  ;;  %v2146_v61 = vpack.c.bf16 %v1682_v59, %v1681_v58  ;;  %v1665_v62 = vld [vmem:[#allocation8 + $0x10] sm:$0xff] }
 0x14d   : > { %1458 = vmatprep.subr.bf16.mxu0 %v2500_v63  ;;  %1587 = vmatprep.subr.bf16.mxu1 %v2503_v0  ;;  %v1666_v63 = vld [vmem:[#allocation8 + $0x18] sm:$0xff]  ;;  %v1683_v0 = vld [vmem:[#allocation8 + $0xa0] sm:$0xff] }
 0x150   : > { %1459 = vmatpush1.bf16.msra.mxu0 %v2498_v1  ;;  %1588 = vmatpush1.bf16.msra.mxu1 %v2501_v2  ;;  %v1684_v1 = vld [vmem:[#allocation8 + $0xa8] sm:$0xff]  ;;  %v2148_v2 = vpack.c.bf16 %v1666_v63, %v1665_v62 }
 0x151   : > { %1460 = vmatprep.subr.bf16.mxu0 %v2506_v3  ;;  %1589 = vmatprep.subr.bf16.mxu1 %v2509_v5  ;;  %v2150_v3 = vpack.c.bf16 %v1684_v1, %v1683_v0  ;;  %v1667_v5 = vld [vmem:[#allocation8 + $0x20] sm:$0xff] }
 0x154   : > { %1461 = vmatpush1.bf16.msra.mxu0 %v2504_v6  ;;  %1590 = vmatpush1.bf16.msra.mxu1 %v2507_v7  ;;  %v1668_v6 = vld [vmem:[#allocation8 + $0x28] sm:$0xff]  ;;  %v1685_v7 = vld [vmem:[#allocation8 + $0xb0] sm:$0xff] }
 0x155   : > { %1462 = vmatprep.subr.bf16.mxu0 %v2512_v8  ;;  %1591 = vmatprep.subr.bf16.mxu1 %v2515_v9  ;;  %v1686_v8 = vld [vmem:[#allocation8 + $0xb8] sm:$0xff]  ;;  %v2152_v9 = vpack.c.bf16 %v1668_v6, %v1667_v5 }
 0x158   : > { %1463 = vmatpush1.bf16.msra.mxu0 %v2510_v4  ;;  %1592 = vmatpush1.bf16.msra.mxu1 %v2513_v10  ;;  %v2154_v4 = vpack.c.bf16 %v1686_v8, %v1685_v7  ;;  %v1669_v10 = vld [vmem:[#allocation8 + $0x30] sm:$0xff] }
 0x159   : > { %1464 = vmatprep.subr.bf16.mxu0 %v2518_v12  ;;  %1593 = vmatprep.subr.bf16.mxu1 %v2521_v13  ;;  %v1670_v12 = vld [vmem:[#allocation8 + $0x38] sm:$0xff]  ;;  %v1687_v13 = vld [vmem:[#allocation8 + $0xc0] sm:$0xff] }
 0x15c   : > { %1465 = vmatpush1.bf16.msra.mxu0 %v2516_v15  ;;  %1594 = vmatpush1.bf16.msra.mxu1 %v2519_v16  ;;  %v2156_v15 = vpack.c.bf16 %v1670_v12, %v1669_v10 }
 0x15d   : > { %1466 = vmatprep.subr.bf16.mxu0 %v2524_v17  ;;  %1595 = vmatprep.subr.bf16.mxu1 %v2527_v18  ;;  %v1671_v17 = vld [vmem:[#allocation8 + $0x40] sm:$0xff]  ;;  %v1672_v18 = vld [vmem:[#allocation8 + $0x48] sm:$0xff] }
 0x160   : > { %1467 = vmatpush1.bf16.msra.mxu0 %v2522_v19  ;;  %1596 = vmatpush1.bf16.msra.mxu1 %v2525_v20  ;;  %v1689_v19 = vld [vmem:[#allocation8 + $0xd0] sm:$0xff]  ;;  %v1690_v20 = vld [vmem:[#allocation8 + $0xd8] sm:$0xff] }
 0x161   : > { %1479 = vmatprep.subr.bf16.mxu0 %v2530_v21  ;;  %1608 = vmatprep.subr.bf16.mxu1 %v2533_v22  ;;  %v2160_v21 = vpack.c.bf16 %v1672_v18, %v1671_v17  ;;  %v2162_v22 = vpack.c.bf16 %v1690_v20, %v1689_v19 }
 0x163   : > { %1469 = vmatmul.mubr.bf16.vlgmr.msra.gmra.mrb[0].mxu0 %v3130_v14  ;;  %1598 = vmatmul.mubr.bf16.vlgmr.msra.gmra.mrb[0].mxu1 %v3130_v14  ;;  %v2546_v14 = vld [vmem:[#allocation7 + $0x460] ss:$16 sps:$4 sm:$0xff]  }
 0x164   : > { %1480 = vmatpush1.bf16.msra.mxu0 %v2528_v23  ;;  %1609 = vmatpush1.bf16.msra.mxu1 %v2531_v11  ;;  %v1673_v23 = vld [vmem:[#allocation8 + $0x50] sm:$0xff]  ;;  %v1674_v11 = vld [vmem:[#allocation8 + $0x58] sm:$0xff] }
 0x165   : > { %1481 = vmatprep.subr.bf16.mxu0 %v2536_v24  ;;  %1610 = vmatprep.subr.bf16.mxu1 %v2539_v25  ;;  %v1691_v24 = vld [vmem:[#allocation8 + $0xe0] sm:$0xff]  ;;  %v1692_v25 = vld [vmem:[#allocation8 + $0xe8] sm:$0xff] }
 0x166   : > { %1511 = vmatprep.mubr.bf16.mxu0 %v2800_v31  ;;  %1640 = vmatprep.mubr.bf16.mxu1 %v2800_v31 }
 0x168   : > { %1482 = vmatpush1.bf16.msra.mxu0 %v2534_v26  ;;  %1611 = vmatpush1.bf16.msra.mxu1 %v2537_v27  ;;  %v2164_v26 = vpack.c.bf16 %v1674_v11, %v1673_v23  ;;  %v2166_v27 = vpack.c.bf16 %v1692_v25, %v1691_v24 }
 0x169   : > { %1483 = vmatprep.subr.bf16.mxu0 %v2542_v28  ;;  %1612 = vmatprep.subr.bf16.mxu1 %v2545_v30  ;;  %v1675_v28 = vld [vmem:[#allocation8 + $0x60] sm:$0xff]  ;;  %v1676_v30 = vld [vmem:[#allocation8 + $0x68] sm:$0xff] }
 0x16a   : > { %v2168_v31 = vpack.c.bf16 %v1676_v30, %v1675_v28 }
 0x16c   : > { %1484 = vmatpush1.bf16.msra.mxu0 %v2540_v32  ;;  %1613 = vmatpush1.bf16.msra.mxu1 %v2543_v33  ;;  %v1693_v32 = vld [vmem:[#allocation8 + $0xf0] sm:$0xff]  ;;  %v1694_v33 = vld [vmem:[#allocation8 + $0xf8] sm:$0xff] }
 0x16d   : > { %1485 = vmatprep.subr.bf16.mxu0 %v2548_v34  ;;  %1614 = vmatprep.subr.bf16.mxu1 %v2551_v35  ;;  %v2170_v34 = vpack.c.bf16 %v1694_v33, %v1693_v32  ;;  %v1677_v35 = vld [vmem:[#allocation8 + $0x70] sm:$0xff] }
 0x170   : > { %1486 = vmatpush1.bf16.msra.mxu0 %v2546_v14  ;;  %1615 = vmatpush1.bf16.msra.mxu1 %v2549_v36  ;;  %v1678_v14 = vld [vmem:[#allocation8 + $0x78] sm:$0xff] }
 0x171   : > { %1487 = vmatprep.subr.bf16.mxu0 %v2554_v37  ;;  %1616 = vmatprep.subr.bf16.mxu1 %v2557_v38  ;;  %v2172_v36 = vpack.c.bf16 %v1678_v14, %v1677_v35 }
 0x174   : > { %1488 = vmatpush1.bf16.msra.mxu0 %v2552_v39  ;;  %1617 = vmatpush1.bf16.msra.mxu1 %v2555_v40 }
 0x175   : > { %1489 = vmatprep.subr.bf16.mxu0 %v2560_v41  ;;  %1618 = vmatprep.subr.bf16.mxu1 %v2563_v42 }
 0x178   : > { %1490 = vmatpush1.bf16.msra.mxu0 %v2558_v43  ;;  %1619 = vmatpush1.bf16.msra.mxu1 %v2561_v44 }
 0x179   : > { %1491 = vmatprep.subr.bf16.mxu0 %v2566_v45  ;;  %1620 = vmatprep.subr.bf16.mxu1 %v2569_v46 }
 0x17c   : > { %1492 = vmatpush1.bf16.msra.mxu0 %v2564_v47  ;;  %1621 = vmatpush1.bf16.msra.mxu1 %v2567_v48 }
 0x17d   : > { %1493 = vmatprep.subr.bf16.mxu0 %v2572_v49  ;;  %1622 = vmatprep.subr.bf16.mxu1 %v2575_v50 }
 0x180   : > { %1494 = vmatpush1.bf16.msra.mxu0 %v2570_v53  ;;  %1623 = vmatpush1.bf16.msra.mxu1 %v2573_v54 }
 0x181   : > { %2143 = vmatprep.subr.bf16.mxu0 %v2142_v55  ;;  %2174 = vmatprep.subr.bf16.mxu1 %v2142_v55 }
 0x183   : > { %1512 = vmatmul.mubr.bf16.vlgmr.msra.gmra.mrb[0].mxu0 %v3136_v29  ;;  %1641 = vmatmul.mubr.bf16.vlgmr.msra.gmra.mrb[0].mxu1 %v3136_v29  ;;  %v1688_v29 = vld [vmem:[#allocation8 + $0xc8] sm:$0xff] }
 0x184   : > { %2145 = vmatpush3.bf16.msra.mxu0 %v2144_v60  ;;  %2182 = vmatpush3.bf16.msra.mxu1 %v2144_v60  ;;  %v2158_v16 = vpack.c.bf16 %v1688_v29, %v1687_v13 }
 0x185   : > { %2147 = vmatprep.subr.bf16.mxu0 %v2146_v61  ;;  %2175 = vmatprep.subr.bf16.mxu1 %v2146_v61 }
 0x188   : > { %2149 = vmatpush3.bf16.msra.mxu0 %v2148_v2  ;;  %2183 = vmatpush3.bf16.msra.mxu1 %v2148_v2 }
 0x189   : > { %2151 = vmatprep.subr.bf16.mxu0 %v2150_v3  ;;  %2176 = vmatprep.subr.bf16.mxu1 %v2150_v3 }
 0x18c   : > { %2153 = vmatpush3.bf16.msra.mxu0 %v2152_v9  ;;  %2184 = vmatpush3.bf16.msra.mxu1 %v2152_v9 }
 0x18d   : > { %2155 = vmatprep.subr.bf16.mxu0 %v2154_v4  ;;  %2177 = vmatprep.subr.bf16.mxu1 %v2154_v4 }
 0x190   : > { %2157 = vmatpush3.bf16.msra.mxu0 %v2156_v15  ;;  %2185 = vmatpush3.bf16.msra.mxu1 %v2156_v15 }
 0x191   : > { %2159 = vmatprep.subr.bf16.mxu0 %v2158_v16  ;;  %2178 = vmatprep.subr.bf16.mxu1 %v2158_v16 }
 0x194   : > { %2161 = vmatpush3.bf16.msra.mxu0 %v2160_v21  ;;  %2186 = vmatpush3.bf16.msra.mxu1 %v2160_v21 }
 0x195   : > { %2163 = vmatprep.subr.bf16.mxu0 %v2162_v22  ;;  %2179 = vmatprep.subr.bf16.mxu1 %v2162_v22 }
 0x198   : > { %2165 = vmatpush3.bf16.msra.mxu0 %v2164_v26  ;;  %2187 = vmatpush3.bf16.msra.mxu1 %v2164_v26 }
 0x199   : > { %2167 = vmatprep.subr.bf16.mxu0 %v2166_v27  ;;  %2180 = vmatprep.subr.bf16.mxu1 %v2166_v27 }
 0x19c   : > { %2169 = vmatpush3.bf16.msra.mxu0 %v2168_v31  ;;  %2188 = vmatpush3.bf16.msra.mxu1 %v2168_v31 }
 0x19d   : > { %2171 = vmatprep.subr.bf16.mxu0 %v2170_v34  ;;  %2181 = vmatprep.subr.bf16.mxu1 %v2170_v34 }
 0x1a0   : > { %2173 = vmatpush3.bf16.msra.mxu0 %v2172_v36  ;;  %2189 = vmatpush3.bf16.msra.mxu1 %v2172_v36 }
 0x256   : > { %v1513_v37 = vpop.f32.mrb[0].mxu0  ;;  %v1642_v38 = vpop.f32.mrb[0].mxu1 }
 0x257   : > { %v1651_v39 = vmul.f32 %v1513_v37, %v1513_v37  ;;  %v1655_v40 = vmul.f32 %v1642_v38, %v1642_v38  ;;  %v1515_v41 = vpop.f32.mrb[1].mxu0  ;;  %v1644_v42 = vpop.f32.mrb[1].mxu1 }
 0x258   : > { %v1652_v43 = vmul.f32 %v1515_v41, %v1515_v41  ;;  %v1656_v44 = vmul.f32 %v1644_v42, %v1644_v42  ;;  %v1517_v45 = vpop.f32.mrb[2].mxu0  ;;  %v1646_v46 = vpop.f32.mrb[2].mxu1 }
 0x259   : > { %v1659_v47 = vadd.f32 %v1655_v40, %v1651_v39  ;;  %v1653_v48 = vmul.f32 %v1517_v45, %v1517_v45  ;;  %v1657_v49 = vmul.f32 %v1646_v46, %v1646_v46  ;;  %v1519_v50 = vpop.f32.mrb[3].mxu0  ;;  %v1648_v51 = vpop.f32.mrb[3].mxu1 }
 0x25a   : > { %v1660_v52 = vadd.f32 %v1656_v44, %v1652_v43  ;;  %v1654_v53 = vmul.f32 %v1519_v50, %v1519_v50  ;;  %v1658_v54 = vmul.f32 %v1648_v51, %v1648_v51 }
 0x25b   : > { %v1661_v55 = vadd.f32 %v1657_v49, %v1653_v48 }
 0x25c   : > { %v1662_v56 = vadd.f32 %v1658_v54, %v1654_v53  ;;  %1759 = vmatprep.mubr.f32.mxu0 %v1660_v52 }
 0x25d   : > { %1760 = vmatmul.mubr.f32.vlgmr.msra.gmra.mrb[4].mxu0 %v1659_v47 }
 0x25e   : > { %1764 = vmatprep.mubr.f32.mxu1 %v1662_v56 }
 0x25f   : > { %1765 = vmatmul.mubr.f32.vlgmr.msra.gmra.mrb[4].mxu1 %v1661_v55 }
 0x330   : > { %v2136_v57 = vpop.f32.mrb[4].mxu0 }
 0x331   : > { %v2137_v58 = vpop.f32.mrb[5].mxu0 }
 0x332   : > { %v2138_v59 = vadd.f32 %v2137_v58, %v2136_v57  ;;  %v2139_v60 = vpop.f32.mrb[4].mxu1 }
 0x333   : > { %v2140_v61 = vpop.f32.mrb[5].mxu1 }
 0x334   : > { %1770 = vst [vmem:[%s318_s11] sm:$0xff] %v2138_v59  ;;  %v2141_v62 = vadd.f32 %v2140_v61, %v2139_v60 }
 0x336   : > { %1771 = vst [vmem:[%s318_s11 + $0x8] sm:$0xff] %v2141_v62 }
 0x337   : > { %2706 = shalt.err (!%p2703_p7)
}
 0x338   : > { %s2707_s27 = scalar_lea.hbm %s3150_s29, 256  ;;  %s2711_s2 = scalar_lea.hbm %s3203_s4, 512 }
 0x339   : > { %p2708_p13 = scmp.ne.s32.totalorder %s3150_s29, %s2707_s27  ;;  %p2712_p2 = scmp.lt.u32.totalorder %s3150_s29, %s3203_s4 }
 0x33a   : > { %p2713_p11 = scmp.lt.u32.totalorder %s2711_s2, %s2707_s27  ;;  %p2715_p1 = scmp.lt.u32.totalorder %s2707_s27, %s3150_s29 }
 0x33b   : > { %p2709_p8 = pnand %p2708_p13, %p3235_p6 }
 0x33c   : > { %p2714_p0 = por %p2713_p11, %p2712_p2 }
 0x33d   : > { %p2710_p12 = pneg %p2709_p8 }
 0x33e   : > { %p2716_p10 = por %p2715_p1, %p2714_p0 }
 0x340   : > { %p2717_p3 = pnand %p2716_p10, %p2710_p12 }
 0x342   : > { %2720 = shalt.err (!%p2717_p3)
}
 0x343   : > { %s2802_s14 = smov 128   ;;  %s2803_s21 = smov 8  }
 0x344   : > { %2219 = dma.vmem_to_hbm [thread:$0]  (%p3235_p6), %s3145_s12, 256, %s3150_s29, %s1773_s0, %s2802_s14, %s2802_s14, %s2803_s21  }
 0x345 PF: > { %s1803_s23 = sand.u32 1, %s2767_s15   ;;  %p3236_p4 = scmp.ne.s32.totalorder %s3215_s24, 0 }
 0x346   : > { %p3237_p9 = scmp.ge.s32.totalorder %s2787_s20, 2  ;;  %s1804_s9 = scalar_lea.sflag [#allocation4], %s1803_s23 }
 0x348   : > { %p2236_p5 = pnand %p3237_p9, %p3236_p4 }
 0x34a   : > { %2762 = dma.done.wait (!%p2236_p5), %s1804_s9, 256  }
 0x34b   : > { %2764 = vsyncadd (!%p2236_p5), %s1804_s9, 4294967040  ;;  %s24_s20 = sadd.s32 1, %s2787_s20   ;;  %s3238_s11 = sld [smem:[#allocation17_spill]] }
 0x34c   : > { %p21_p7 = scmp.ge.s32.totalorder %s24_s20, 4   ;;  %s3239_s28 = sld [smem:[#allocation16_spill]] }
 0x34d   : > { %s3240_s15 = smov %s2771_s16  ;;  %s3241_s16 = smov %s2775_s17 }
 0x34e   : > { %s3243_s18 = smov %s2783_s19  ;;  %23 = sbr.rel (!%p21_p7) target bundleno = 13 (0xd), region = 102 }
 0x351   : > { %s3242_s17 = smov %s3238_s11 }
 0x352   : > { %s3244_s19 = smov %s3239_s28 }
 0x355   :  { %1809 = vsyncpa [#allocation3], 1 }
 0x356   :  { %1811 = vsyncpa [#allocation3 + $0x1], 1 }
 0x357   :  { %1812 = vsyncpa [#allocation6], 1 }
 0x358   :  { %1814 = vsyncpa [#allocation6 + $0x1], 1 }
 0x359   :  { %1815 = vsyncpa [#allocation9], 1 }
 0x35a   :  { %1816 = vsyncpa [#allocation4], 1 }
 0x35b   :  { %1818 = vsyncpa [#allocation4 + $0x1], 1 }

</bundles_post_ra>
